<compile_context>
chip_gen: v7x
topology: tpu7x:2x2x1
jax: 0.10.0
libtpu: 0.0.40
codegen_flags: <defaults>
</compile_context>

<pallas_src>
import functools

import jax
import jax.numpy as jnp
from jax.experimental import pallas as pl
from jax.experimental.pallas import tpu as pltpu


# ---------------------------------------------------------------------------
# Sizing helpers
# ---------------------------------------------------------------------------

def _round_up(n, m):
    return ((n + m - 1) // m) * m


def _sublane_multiple(itemsize):
    # f32 -> 8, bf16 -> 16, int8/fp8 -> 32 (sub-32-bit packs along sublanes).
    return max(8, 32 // itemsize)


def _padded_image_bytes(C, HW, itemsize, channels_last):
    """VMEM footprint of ONE image slab after (sublane, lane) tile padding."""
    sub = _sublane_multiple(itemsize)
    if channels_last:            # block (Bt, HW, C): HW on sublanes, C on lanes
        return _round_up(HW, sub) * _round_up(C, 128) * itemsize
    return _round_up(C, sub) * _round_up(HW, 128) * itemsize


def _tpu_vmem_capacity_bytes():
    try:
        info = pltpu.get_tpu_info()
        cap = getattr(info, "vmem_capacity_bytes", None)
        if cap:
            return int(cap)
    except Exception:
        pass
    # Unknown -> assume the 128 MiB class; the request below stays need-based
    # (tens of MiB at most), so this is still safe on a 64 MiB v7x core.
    return 128 << 20


def _vmem_limit(buffered_bytes, vmem_cap, slack=4 << 20):
    """Need-based limit from padded buffered footprints, capped at 75% of VMEM."""
    need = int(sum(buffered_bytes)) + slack
    cap = max(16 << 20, (int(vmem_cap) * 3) // 4)
    return int(min(max(need, 16 << 20), cap))


def _pick_batch_tile(B, padded_img_bytes, max_block_bytes, min_grid_steps,
                     min_block_bytes):
    """Largest Bt dividing B whose padded x block fits the budget while keeping
    >= min_grid_steps grid steps when B permits.  Returns None if even a single
    image slab does not fit (caller uses the two-pass fallback)."""
    feasible = [d for d in range(1, B + 1)
                if B % d == 0 and d * padded_img_bytes <= max_block_bytes]
    if not feasible:
        return None
    best = feasible[0]
    for target in (min_grid_steps, 2, 1):
        cands = [d for d in feasible if B // d >= target]
        if cands:
            best = max(cands)
            break
    # Don't let the min-grid target shrink blocks below min_block_bytes when a
    # larger tile still leaves >= 2 grid steps (matters on single-TC v5e/v6e).
    if best * padded_img_bytes < min_block_bytes:
        bigger = [d for d in feasible
                  if B // d >= 2 and d * padded_img_bytes >= min_block_bytes]
        if bigger:
            best = min(bigger)
    return best


# ---------------------------------------------------------------------------
# Fused single-pass kernels (pool + excitation + scale in one slab visit)
# ---------------------------------------------------------------------------

def _se_kernel_nchw(x_ref, w1t_ref, w2t_ref, o_ref):
    # x_ref: (Bt, C, HW); w1t_ref: (C, Cr) f32; w2t_ref: (Cr, C) f32
    x = x_ref[...]
    # Squeeze: f32 accumulation fused into the reduction (no f32 slab copy).
    y = jnp.mean(x, axis=-1, dtype=jnp.float32)                      # (Bt, C)
    # Excitation: FC -> ReLU -> FC -> Sigmoid (weights already f32, no per-step cast).
    h = jnp.maximum(jnp.dot(y, w1t_ref[...],
                            preferred_element_type=jnp.float32), 0.0)
    s = jax.nn.sigmoid(jnp.dot(h, w2t_ref[...],
                               preferred_element_type=jnp.float32))  # (Bt, C)
    # Scale: cast the gate to x's dtype BEFORE the full-slab multiply.
    o_ref[...] = (x * s.astype(x.dtype)[:, :, None]).astype(o_ref.dtype)


def _se_kernel_nhwc(x_ref, w1t_ref, w2t_ref, o_ref):
    # x_ref: (Bt, HW, C) — C on the lane axis, so loads/stores are lane-dense
    # whenever C % 128 == 0, and the gate broadcasts along sublanes (no relayout).
    x = x_ref[...]
    y = jnp.mean(x, axis=1, dtype=jnp.float32)                       # (Bt, C)
    h = jnp.maximum(jnp.dot(y, w1t_ref[...],
                            preferred_element_type=jnp.float32), 0.0)
    s = jax.nn.sigmoid(jnp.dot(h, w2t_ref[...],
                               preferred_element_type=jnp.float32))  # (Bt, C)
    o_ref[...] = (x * s.astype(x.dtype)[:, None, :]).astype(o_ref.dtype)


# ---------------------------------------------------------------------------
# Two-pass fallback kernels (for slabs too large for a single fused block)
# ---------------------------------------------------------------------------

def _pool_kernel(x_ref, sum_ref, *, hw_axis, hw_total, hw_tile):
    # Accumulate per-image channel sums across the HW ("arbitrary") grid axis.
    hw = pl.program_id(1)

    @pl.when(hw == 0)
    def _():
        sum_ref[...] = jnp.zeros_like(sum_ref)

    x = x_ref[...]
    if hw_total % hw_tile != 0:
        # Mask the ragged last spatial tile (reads beyond bounds are padding).
        pos = jax.lax.broadcasted_iota(jnp.int32, x.shape, hw_axis) + hw * hw_tile
        x = jnp.where(pos < hw_total, x, jnp.zeros_like(x))
    sum_ref[...] += jnp.sum(x, axis=hw_axis, keepdims=True, dtype=jnp.float32)


def _scale_kernel(x_ref, g_ref, o_ref):
    # g_ref has size 1 along the spatial axis -> broadcast multiply.
    o_ref[...] = (x_ref[...] * g_ref[...]).astype(o_ref.dtype)


def _se_two_pass(x_flat, w1t, w2t, *, channels_last, hw_total, itemsize,
                 max_block_bytes, vmem_cap):
    """Pool kernel + tiny JAX excitation + scale kernel.  Costs one extra read
    of x but is the only shape-general path when a single padded image slab
    exceeds the per-block budget (e.g. C=128..256 with 56x56 / 112x112 spatial
    on v7x's 64 MiB VMEM)."""
    B = x_flat.shape[0]
    if channels_last:
        C = x_flat.shape[2]
        hw_axis = 1
        per_unit = 128 * _round_up(C, 128) * itemsize    # 128 spatial rows
    else:
        C = x_flat.shape[1]
        hw_axis = 2
        per_unit = _round_up(C, _sublane_multiple(itemsize)) * 128 * itemsize

    n_units = max(1, max_block_bytes // per_unit)
    # TODO(synk): if even a 128-wide spatial slice of one image exceeds the
    # budget (extreme channel counts), a channel-tiled variant would be needed.
    if hw_total >= 128:
        hw_tile = 128 * min(n_units, max(1, hw_total // 128))
    else:
        hw_tile = hw_total
    n_hw = pl.cdiv(hw_total, hw_tile)
    block_bytes = per_unit * max(1, hw_tile // 128)
    grid = (B, n_hw)

    if channels_last:
        x_block = (1, hw_tile, C)
        pooled_shape = (B, 1, C)
        pooled_block = (1, 1, C)
        x_index = lambda b, h: (b, h, 0)
    else:
        x_block = (1, C, hw_tile)
        pooled_shape = (B, C, 1)
        pooled_block = (1, C, 1)
        x_index = lambda b, h: (b, 0, h)
    pooled_index = lambda b, h: (b, 0, 0)

    # Pass 1: global average pool (sums in f32, divided below).
    pooled = pl.pallas_call(
        functools.partial(_pool_kernel, hw_axis=hw_axis,
                          hw_total=hw_total, hw_tile=hw_tile),
        out_shape=jax.ShapeDtypeStruct(pooled_shape, jnp.float32),
        grid_spec=pltpu.PrefetchScalarGridSpec(
            num_scalar_prefetch=0,
            grid=grid,
            in_specs=[pl.BlockSpec(x_block, x_index)],
            out_specs=pl.BlockSpec(pooled_block, pooled_index)),
        compiler_params=pltpu.CompilerParams(
            dimension_semantics=("parallel", "arbitrary"),
            vmem_limit_bytes=_vmem_limit([2 * block_bytes], vmem_cap)),
        cost_estimate=pl.CostEstimate(
            flops=B * C * hw_total, transcendentals=0,
            bytes_accessed=B * C * hw_total * itemsize + B * C * 4),
    )(x_flat)

    # Tiny excitation on (B, C): plain JAX (negligible next to two passes of x).
    y = pooled.reshape(B, C) / float(hw_total)
    h = jnp.maximum(jnp.dot(y, w1t, preferred_element_type=jnp.float32), 0.0)
    s = jax.nn.sigmoid(jnp.dot(h, w2t, preferred_element_type=jnp.float32))
    gate = s.astype(x_flat.dtype).reshape(pooled_shape)

    # Pass 2: scale x by the gate.
    out_flat = pl.pallas_call(
        _scale_kernel,
        out_shape=jax.ShapeDtypeStruct(x_flat.shape, x_flat.dtype),
        grid_spec=pltpu.PrefetchScalarGridSpec(
            num_scalar_prefetch=0,
            grid=grid,
            in_specs=[pl.BlockSpec(x_block, x_index),
                      pl.BlockSpec(pooled_block, pooled_index)],
            out_specs=pl.BlockSpec(x_block, x_index)),
        compiler_params=pltpu.CompilerParams(
            dimension_semantics=("parallel", "parallel"),
            vmem_limit_bytes=_vmem_limit([4 * block_bytes], vmem_cap)),
        cost_estimate=pl.CostEstimate(
            flops=B * C * hw_total, transcendentals=0,
            bytes_accessed=2 * B * C * hw_total * itemsize),
    )(x_flat, gate)
    return out_flat


# ---------------------------------------------------------------------------
# Public wrapper
# ---------------------------------------------------------------------------

def se_layer(x, w1, w2, *, channels_last=False, donate_x=False,
             max_block_bytes=None):
    """Squeeze-and-excitation forward pass.

    x:  (B, C, H, W) by default, or (B, H, W, C) if channels_last=True.
    w1: (C//r, C)  first nn.Linear weight (bias-free).
    w2: (C, C//r)  second nn.Linear weight (bias-free).
    donate_x: set True only when the caller actually donates x's buffer;
        otherwise aliasing would make XLA insert a defensive full copy.
    """
    if channels_last:
        B, H, W, C = x.shape
    else:
        B, C, H, W = x.shape
    HW = H * W
    Cr = w1.shape[0]
    itemsize = x.dtype.itemsize

    x_flat = x.reshape(B, HW, C) if channels_last else x.reshape(B, C, HW)

    # Pre-transpose and pre-cast weights ONCE (no per-step cast in the kernel).
    w1t = jnp.asarray(w1, jnp.float32).T    # (C, Cr)
    w2t = jnp.asarray(w2, jnp.float32).T    # (Cr, C)

    # --- per-generation budgets -------------------------------------------
    vmem_cap = _tpu_vmem_capacity_bytes()
    small_vmem = vmem_cap <= (80 << 20)                 # v7x-class (64 MiB/TC)
    if max_block_bytes is None:
        max_block_bytes = (4 << 20) if small_vmem else (8 << 20)
    min_grid_steps = 8 if small_vmem else 4             # >=3-4 steps per TC
    min_block_bytes = (1 << 20) if small_vmem else (2 << 20)

    padded_img = _padded_image_bytes(C, HW, itemsize, channels_last)
    Bt = _pick_batch_tile(B, padded_img, max_block_bytes,
                          min_grid_steps, min_block_bytes)

    if Bt is None:
        # A single padded image slab exceeds the block budget -> two-pass path.
        out_flat = _se_two_pass(x_flat, w1t, w2t, channels_last=channels_last,
                                hw_total=HW, itemsize=itemsize,
                                max_block_bytes=max_block_bytes,
                                vmem_cap=vmem_cap)
        return out_flat.reshape(x.shape)

    # --- fused single-pass path --------------------------------------------
    block_bytes = Bt * padded_img
    in_bufs = 3 if small_vmem else 2        # 3-deep input pipeline on v7x
    w_pad_bytes = (_round_up(C, 8) * _round_up(Cr, 128)
                   + _round_up(Cr, 8) * _round_up(C, 128)) * 4
    vmem_limit = _vmem_limit([in_bufs * block_bytes, 2 * block_bytes,
                              2 * w_pad_bytes], vmem_cap)

    if channels_last:
        kernel = _se_kernel_nhwc
        x_block = (Bt, HW, C)
    else:
        kernel = _se_kernel_nchw
        x_block = (Bt, C, HW)
    x_index = lambda b: (b, 0, 0)

    if small_vmem:
        # Deeper input buffering rides out DMA-issue jitter at 3.2 TB/s when
        # the smaller v7x block leaves VMEM headroom (accounted above).
        x_in_spec = pl.BlockSpec(x_block, x_index, pipeline_mode=pl.Buffered(3))
    else:
        x_in_spec = pl.BlockSpec(x_block, x_index)

    cost = pl.CostEstimate(
        flops=2 * B * C * HW + 4 * B * C * Cr,
        transcendentals=B * C,
        bytes_accessed=2 * B * C * HW * itemsize + 2 * C * Cr * 4)

    out_flat = pl.pallas_call(
        kernel,
        out_shape=jax.ShapeDtypeStruct(x_flat.shape, x.dtype),
        grid_spec=pltpu.PrefetchScalarGridSpec(
            num_scalar_prefetch=0,
            grid=(B // Bt,),
            in_specs=[x_in_spec,
                      pl.BlockSpec((C, Cr), lambda b: (0, 0)),
                      pl.BlockSpec((Cr, C), lambda b: (0, 0))],
            out_specs=pl.BlockSpec(x_block, x_index)),
        compiler_params=pltpu.CompilerParams(
            dimension_semantics=("parallel",),
            vmem_limit_bytes=vmem_limit),
        cost_estimate=cost,
        # Alias only on genuine donation; otherwise XLA adds a defensive copy.
        input_output_aliases=({0: 0} if donate_x else {}),
    )(x_flat, w1t, w2t)

    return out_flat.reshape(x.shape)


def se_layer_ref(x, w1, w2):
    """Plain-JAX reference mirroring the PyTorch module (NCHW)."""
    y = jnp.mean(x, axis=(2, 3))                     # (B, C)
    y = jnp.maximum(y @ w1.T, 0.0)                   # (B, C//r)
    y = jax.nn.sigmoid(y @ w2.T)                     # (B, C)
    return x * y[:, :, None, None]


if __name__ == "__main__":
    B, C, H, W = 2, 32, 16, 16
    reduction = 16
    Cr = C // reduction

    key = jax.random.PRNGKey(0)
    kx, k1, k2 = jax.random.split(key, 3)
    x = jax.random.normal(kx, (B, C, H, W), dtype=jnp.float32)
    # Deterministic synthetic weights (nn.Linear shapes, no bias).
    w1 = jax.random.normal(k1, (Cr, C), dtype=jnp.float32) * 0.1
    w2 = jax.random.normal(k2, (C, Cr), dtype=jnp.float32) * 0.1

    ref = jax.block_until_ready(se_layer_ref(x, w1, w2))

    # 1) Fused single-pass path, NCHW (matches the PyTorch module layout).
    out = jax.block_until_ready(se_layer(x, w1, w2))
    assert out.shape == (B, C, H, W)
    assert jnp.allclose(out, ref, atol=1e-5, rtol=1e-5)

    # 2) Fused single-pass path, channels-last (C on the lane axis).
    x_nhwc = jnp.transpose(x, (0, 2, 3, 1))
    out_nhwc = jax.block_until_ready(se_layer(x_nhwc, w1, w2, channels_last=True))
    assert out_nhwc.shape == (B, H, W, C)
    assert jnp.allclose(jnp.transpose(out_nhwc, (0, 3, 1, 2)), ref,
                        atol=1e-5, rtol=1e-5)

    # 3) Two-pass fallback path (forced by a tiny per-block budget so the
    #    large-slab code path is compile- and correctness-tested too).
    out_fb = jax.block_until_ready(se_layer(x, w1, w2, max_block_bytes=24 * 1024))
    assert out_fb.shape == (B, C, H, W)
    assert jnp.allclose(out_fb, ref, atol=1e-5, rtol=1e-5)

    print("KERNEL_OK")
</pallas_src>

<mosaic_0001>
module attributes {stable_mosaic.version = 11 : i64} {
  func.func @_se_kernel_nchw(%arg0: i32, %arg1: memref<1x32x256xf32, #tpu.memory_space<vmem>>, %arg2: memref<32x2xf32, #tpu.memory_space<vmem>>, %arg3: memref<2x32xf32, #tpu.memory_space<vmem>>, %arg4: memref<1x32x256xf32, #tpu.memory_space<vmem>>) attributes {dimension_semantics = [#tpu.dimension_semantics<parallel>], iteration_bounds = array<i64: 2>, scalar_prefetch = 0 : i64, scratch_operands = 0 : i64, tpu.core_type = #tpu.core_type<tc>, window_params = [{transform_indices = @transform_0, window_bounds = array<i64: 1, 32, 256>}, {pipeline_mode = #tpu.pipeline_mode<synchronous>, transform_indices = @transform_1, window_bounds = array<i64: 32, 2>}, {pipeline_mode = #tpu.pipeline_mode<synchronous>, transform_indices = @transform_2, window_bounds = array<i64: 2, 32>}, {transform_indices = @transform_3, window_bounds = array<i64: 1, 32, 256>}]} {
    %c0 = arith.constant 0 : index
    %c0_0 = arith.constant 0 : index
    %c0_1 = arith.constant 0 : index
    %0 = vector.load %arg1[%c0, %c0_0, %c0_1] : memref<1x32x256xf32, #tpu.memory_space<vmem>>, vector<1x32x256xf32>
    %cst = arith.constant dense<0.000000e+00> : vector<1x32xf32>
    %1 = vector.multi_reduction <add>, %0, %cst [2] : vector<1x32x256xf32> to vector<1x32xf32>
    %cst_2 = arith.constant 2.560000e+02 : f32
    %2 = vector.broadcast %cst_2 : f32 to vector<1x32xf32>
    %3 = arith.divf %1, %2 : vector<1x32xf32>
    %c0_3 = arith.constant 0 : index
    %c0_4 = arith.constant 0 : index
    %4 = vector.load %arg2[%c0_3, %c0_4] : memref<32x2xf32, #tpu.memory_space<vmem>>, vector<32x2xf32>
    %cst_5 = arith.constant dense<0.000000e+00> : vector<1x2xf32>
    %5 = tpu.matmul %3, %4, %cst_5 {dimension_numbers = #tpu.dot_dimension_numbers<[1], [0], [0], [1], [0, 0, 1, 1], [], []>} : vector<1x32xf32>, vector<32x2xf32>, vector<1x2xf32> -> vector<1x2xf32>
    %cst_6 = arith.constant 0.000000e+00 : f32
    %6 = vector.broadcast %cst_6 : f32 to vector<1x2xf32>
    %7 = arith.maximumf %5, %6 : vector<1x2xf32>
    %c0_7 = arith.constant 0 : index
    %c0_8 = arith.constant 0 : index
    %8 = vector.load %arg3[%c0_7, %c0_8] : memref<2x32xf32, #tpu.memory_space<vmem>>, vector<2x32xf32>
    %cst_9 = arith.constant dense<0.000000e+00> : vector<1x32xf32>
    %9 = tpu.matmul %7, %8, %cst_9 {dimension_numbers = #tpu.dot_dimension_numbers<[1], [0], [0], [1], [0, 0, 1, 1], [], []>} : vector<1x2xf32>, vector<2x32xf32>, vector<1x32xf32> -> vector<1x32xf32>
    %10 = arith.negf %9 : vector<1x32xf32>
    %11 = math.exp %10 : vector<1x32xf32>
    %cst_10 = arith.constant 1.000000e+00 : f32
    %12 = vector.broadcast %cst_10 : f32 to vector<1x32xf32>
    %13 = arith.addf %12, %11 : vector<1x32xf32>
    %14 = arith.divf %12, %13 : vector<1x32xf32>
    %15 = vector.shape_cast %14 : vector<1x32xf32> to vector<1x32x1xf32>
    %16 = vector.broadcast %15 : vector<1x32x1xf32> to vector<1x32x256xf32>
    %17 = arith.mulf %0, %16 : vector<1x32x256xf32>
    %c0_11 = arith.constant 0 : index
    %c0_12 = arith.constant 0 : index
    %c0_13 = arith.constant 0 : index
    %18 = vector.load %arg4[%c0_11, %c0_12, %c0_13] : memref<1x32x256xf32, #tpu.memory_space<vmem>>, vector<1x32x256xf32>
    tpu.vector_store %arg4[%c0_11, %c0_12, %c0_13], %17 {strides = array<i32>} : memref<1x32x256xf32, #tpu.memory_space<vmem>>, vector<1x32x256xf32>,
    return
  }
  func.func @transform_0(%arg0: i32) -> (i32, i32, i32) {
    %c0_i32 = arith.constant 0 : i32
    %c0_i32_0 = arith.constant 0 : i32
    %c0_i32_1 = arith.constant 0 : i32
    return %arg0, %c0_i32, %c0_i32_0 : i32, i32, i32
  }
  func.func @transform_1(%arg0: i32) -> (i32, i32) {
    %c0_i32 = arith.constant 0 : i32
    %c0_i32_0 = arith.constant 0 : i32
    %c0_i32_1 = arith.constant 0 : i32
    return %c0_i32, %c0_i32_0 : i32, i32
  }
  func.func @transform_2(%arg0: i32) -> (i32, i32) {
    %c0_i32 = arith.constant 0 : i32
    %c0_i32_0 = arith.constant 0 : i32
    %c0_i32_1 = arith.constant 0 : i32
    return %c0_i32, %c0_i32_0 : i32, i32
  }
  func.func @transform_3(%arg0: i32) -> (i32, i32, i32) {
    %c0_i32 = arith.constant 0 : i32
    %c0_i32_0 = arith.constant 0 : i32
    %c0_i32_1 = arith.constant 0 : i32
    return %arg0, %c0_i32, %c0_i32_0 : i32, i32, i32
  }
}

</mosaic_0001>

<bundles_post_ra>
// kernel: tpu_custom_call.1
= control target key start
LH: loop header
LB: loop body
LE: loop exit
PB: predicated region body
PF: predicated region fallthrough
CT: control target
= control target key end

     0   :  { %8 = vsyncpa [#allocation3], 0  ;;  %s976_s0 = inlined_call_operand.hbm [shape: f32[2,32,256], index: 0, kind: input, shape index: {}]   ;;  %s977_s1 = inlined_call_operand.vmem [shape: f32[32,2], index: 1, kind: input, shape index: {}]   ;;  %s978_s2 = inlined_call_operand.vmem [shape: f32[2,32], index: 2, kind: input, shape index: {}]   ;;  %s979_s3 = inlined_call_operand.hbm [shape: f32[2,32,256], index: 3, kind: output, shape index: {}]  }
   0x1   :  { %10 = vsyncpa [#allocation3 + $0x1], 0 }
   0x2   :  { %11 = vsyncpa [#allocation4], 0 }
   0x3   :  { %13 = vsyncpa [#allocation4 + $0x1], 0  ;;  %s763_s12 = smov 0   ;;  %s765_s13 = smov 0  }
   0x4   :  { %s767_s14 = smov 0   ;;  %s769_s15 = smov 0  }
   0x5 LB: > { %s784_s16 = sadd.s32 4294967295, %s732_s15   ;;  %s530_s17 = sadd.s32 4294967294, %s732_s15   ;;  %s732_s15 = sphi %s769_s15, %s992_s15   ;;  %s728_s14 = sphi %s767_s14, %s991_s14   ;;  %s724_s13 = sphi %s765_s13, %s990_s13   ;;  %s720_s12 = sphi %s763_s12, %s989_s12  }
   0x6   : > { %s788_s18 = sadd.s32 1, %s732_s15   ;;  %s26_s19 = sadd.s32 1, %s728_s14 }
   0x7   : > { %s23_s20 = ssub.s32 %s732_s15, %s788_s18  ;;  %p33_p0 = scmp.ne.s32.totalorder %s728_s14, %s724_s13 }
   0x8   : > { %p24_p1 = scmp.eq.s32.totalorder %s23_s20, 0  ;;  %p34_p2 = scmp.eq.s32.totalorder %s732_s15, 0 }
   0x9   : > { %p39_p3 = scmp.ne.s32.totalorder %s724_s13, %s720_s12  ;;  %p40_p4 = scmp.eq.s32.totalorder %s784_s16, 0 }
   0xa   : > { %s800_s21 = scalar_select %p24_p1, %s728_s14, %s26_s19  }
   0xb   : > { %p802_p5 = por %p34_p2, %p33_p0  ;;  %p806_p6 = por %p40_p4, %p39_p3 }
   0xc   : > { %p105_p7 = scmp.eq.s32.totalorder %s784_s16, 1  ;;  %p111_p8 = scmp.eq.s32.totalorder %s530_s17, 1 }
   0xd   : > { %p591_p10 = scmp.lt.s32.totalorder %s732_s15, 2  ;;  %s137_s26 = sand.u32 1, %s728_s14  }
   0xe   : > { %p813_p11 = por %p105_p7, %p33_p0  ;;  %p817_p12 = por %p111_p8, %p39_p3 }
   0xf   : > { %s548_s27 = sshll.u32 %s732_s15, 10  ;;  %s533_s28 = sshll.u32 %s137_s26, 6 }
  0x10   : > { %s983_s24 = scalar_select %p813_p11, 1, 0 }
  0x11   : > { %s984_s25 = scalar_select %p817_p12, 1, 0 }
  0x12   : > { %s826_s4 = scalar_lea.hbm %s976_s0, %s548_s27  ;;  %s141_s5 = scalar_lea.vmem [#allocation2], %s533_s28 }
  0x13   : > { %s148_s6 = sshll.u32 %s141_s5, 4  ;;  %p830_p13 = pnand %p591_p10, %p802_p5  ;;  %s834_s6 = int_to_ptr.vmem [resolvable:$true] %s148_s6 }
  0x14   : > { %s836_s8 = scalar_lea.sflag [#allocation3], %s137_s26  ;;  %s636_s9 = scalar_lea.hbm %s826_s4, 1024 }
  0x15   : > { %p637_p0 = scmp.ne.s32.totalorder %s826_s4, %s636_s9  ;;  %p638_p1 = pneg %p830_p13 }
  0x16   : > { %s641_s17 = scalar_lea.hbm %s976_s0, 2048  ;;  %p642_p4 = scmp.lt.u32.totalorder %s826_s4, %s976_s0 }
  0x17   : > { %p639_p2 = pnand %p638_p1, %p637_p0  ;;  %p643_p5 = scmp.lt.u32.totalorder %s641_s17, %s636_s9 }
  0x18   : > { %p645_p8 = scmp.lt.u32.totalorder %s636_s9, %s826_s4 }
  0x19   : > { %p640_p3 = pneg %p639_p2  ;;  %p644_p7 = por %p643_p5, %p642_p4 }
  0x1b   : > { %p646_p10 = por %p645_p8, %p644_p7 }
  0x1d   : > { %p647_p9 = pnand %p646_p10, %p640_p3 }
  0x1f   : > { %650 = shalt.err (!%p647_p9)
}
  0x20   : > { %s651_s22 = scalar_lea.vmem %s834_s6, 1024  ;;  %s734_s26 = smov [#allocation2]  }
  0x21   : > { %p652_p0 = scmp.ne.s32.totalorder %s834_s6, %s651_s22  ;;  %s656_s27 = sshll.u32 %s734_s26, 4  ;;  %s657_s27 = int_to_ptr.vmem [resolvable:$false] %s656_s27 }
  0x22   : > { %s658_s28 = scalar_lea.vmem %s657_s27, 2048  ;;  %p659_p11 = scmp.lt.s32.totalorder %s834_s6, %s657_s27 }
  0x23   : > { %p654_p2 = pnand %p652_p0, %p638_p1  ;;  %p660_p4 = scmp.lt.s32.totalorder %s658_s28, %s651_s22 }
  0x25   : > { %p655_p12 = pneg %p654_p2  ;;  %p661_p5 = por %p660_p4, %p659_p11 }
  0x27   : > { %p662_p7 = pnand %p661_p5, %p655_p12 }
  0x29   : > { %665 = shalt.err (!%p662_p7)
}
  0x2a   : > { %s735_s29 = smov 256   ;;  %s736_s30 = smov 16  }
  0x2b   : > { %586 = dma.hbm_to_vmem [thread:$0]  (!%p830_p13), %s826_s4, 1024, %s834_s6, %s836_s8, %s735_s29, %s735_s29, %s736_s30  }
  0x2c   : > { %p536_p9 = scmp.ge.s32.totalorder %s732_s15, 1  ;;  %p156_p1 = scmp.lt.s32.totalorder %s732_s15, 3 }
  0x2e   : > { %p157_p3 = pnand %p536_p9, %p156_p1 }
  0x2f   : > { %s867_s5 = sand.u32 (!%p157_p3), 1, %s724_s13  }
  0x30   : > { %160 = sbr.rel (%p157_p3) target bundleno = 806 (0x326), region = 32  ;;  %s537_s9 = sshll.u32 (!%p157_p3), %s867_s5, 6 }
  0x31   : > { %s163_s10 = scalar_lea.sflag (!%p157_p3), [#allocation3], %s867_s5  ;;  %s166_s11 = scalar_lea.vmem (!%p157_p3), [#allocation2], %s537_s9 }
  0x37   : > { %711 = dma.done.wait (%p806_p6), %s163_s10, 1024  }
  0x38   : > { %713 = vsyncadd (%p806_p6), %s163_s10, 4294966272  ;;  %v877_v0 = vld [vmem:[%s166_s11] sm:$0xff]  ;;  %v879_v1 = vld [vmem:[%s166_s11 + $0x8] sm:$0xff]  ;;  %v737_v15 = vmov 0.0|0.0   ;;  %vm738_vm0 = vmmov 0   ;;  %v739_v19 = vmov 0.0   ;;  %v222_v20 = vlaneseq }
  0x39   : > { %v881_v2 = vld [vmem:[%s166_s11 + $0x20] sm:$0xff]  ;;  %v197_v3 = vadd.f32 %v879_v1, %v877_v0  ;;  %v885_v4 = vld [vmem:[%s166_s11 + $0x28] sm:$0xff]  ;;  %v887_v5 = vld [vmem:[%s166_s11 + $0x10] sm:$0xff]  ;;  %573 = vmatprep.subr.bf16.mxu0 %v737_v15  ;;  %565 = vmatprep.mubr.msk.f32.mxu0 %vm738_vm0, %v739_v19  ;;  %vm233_vm1 = vcmask 130112   ;;  %vm240_vm2 = vcmask 195712   ;;  %vm247_vm3 = vcmask 261312  }
  0x3a   : > { %v889_v6 = vld [vmem:[%s166_s11 + $0x18] sm:$0xff]  ;;  %v203_v7 = vadd.f32 %v885_v4, %v881_v2  ;;  %v893_v8 = vld [vmem:[%s166_s11 + $0x30] sm:$0xff]  ;;  %v214_v12 = vld [vmem:[%s977_s1] sm:$0xff]  ;;  %568 = vmatprep.subr.mxu1 %v739_v19  ;;  %570 = vmatprep.mubr.msk.f32.mxu1 %vm738_vm0, %v739_v19  ;;  %v223_v21 = vand.u32 127, %v222_v20  ;;  %v225_v22 = vshrl.u32 %v222_v20, 7  ;;  %vm249_vm4 = vcmask 261120  }
  0x3b   : > { %v895_v9 = vld [vmem:[%s166_s11 + $0x38] sm:$0xff]  ;;  %198 = vadd.xlane.f32.xlu0 %v197_v3  ;;  %v200_v10 = vadd.f32 %v889_v6, %v887_v5  ;;  %v215_v13 = vld [vmem:[%s977_s1 + $0x8] sm:$0xff]  ;;  %v216_v16 = vld [vmem:[%s977_s1 + $0x10] sm:$0xff]  ;;  %vm328_vm5 = vcmask 1041408   ;;  %vm324_vm6 = vcmask 15360   ;;  %s188_s27 = scalar_lea.vmem [#allocation5], %s537_s9 }
  0x3c   : > { %204 = vadd.xlane.f32.xlu1 %v203_v7  ;;  %v206_v11 = vadd.f32 %v895_v9, %v893_v8  ;;  %v574_v14 = vpack.c.bf16 %v215_v13, %v214_v12  ;;  %v217_v17 = vld [vmem:[%s977_s1 + $0x18] sm:$0xff]  ;;  %v228_v23 = vadd.s32 4294967288, %v223_v21  ;;  %v235_v25 = vadd.s32 4294967280, %v223_v21  ;;  %v323_v45 = vld [vmem:[%s978_s2] sm:$0x3]  ;;  %s457_s28 = sshll.u32 %s188_s27, 4  ;;  %s925_s28 = int_to_ptr.vmem [resolvable:$true] %s457_s28 }
  0x3d   : > { %v577_v18 = vpack.c.bf16 %v217_v17, %v216_v16  ;;  %v242_v26 = vadd.s32 4294967272, %v223_v21  ;;  %v226_v28 = vsub.s32 %v223_v21, %v225_v22  ;;  %569 = vmatpush3.msk.msra.mxu1 %vm328_vm5, %v323_v45  ;;  %v410_v54 = vsub.s32 0, %v225_v22  ;;  %s549_s29 = sshll.u32 %s784_s16, 10  ;;  %s444_s16 = scalar_lea.sflag [#allocation4], %s867_s5 }
  0x3e   : > { %575 = vmatpush3.bf16.msra.mxu0 %v574_v14  ;;  %v231_v30 = vsub.s32 %v228_v23, %v225_v22  ;;  %v238_v31 = vsub.s32 %v235_v25, %v225_v22  ;;  %s930_s10 = scalar_lea.hbm %s979_s3, %s549_s29  ;;  %s666_s11 = scalar_lea.vmem %s925_s28, 1024 }
  0x3f   : > { %201 = vadd.xlane.f32.xlu0 %v200_v10  ;;  %576 = vmatprep.subr.bf16.mxu0 %v737_v15  ;;  %v245_v34 = vsub.s32 %v242_v26, %v225_v22  ;;  %p667_p6 = scmp.ne.s32.totalorder %s925_s28, %s666_s11  ;;  %p986_p11 = scmp.ne.s32.totalorder %s983_s24, 0 }
  0x40   : > { %207 = vadd.xlane.f32.xlu1 %v206_v11  ;;  %s740_s23 = smov [#allocation5]  }
  0x41   : > { %p668_p12 = pnand %p667_p6, %p986_p11  ;;  %s670_s4 = sshll.u32 %s740_s23, 4  ;;  %s671_s4 = int_to_ptr.vmem [resolvable:$false] %s670_s4 }
  0x42   : > { %578 = vmatpush3.bf16.msra.mxu0 %v577_v18  ;;  %s672_s6 = scalar_lea.vmem %s671_s4, 2048  ;;  %p673_p8 = scmp.lt.s32.totalorder %s925_s28, %s671_s4 }
  0x43   : > { %p669_p13 = pneg %p668_p12  ;;  %p674_p10 = scmp.lt.s32.totalorder %s672_s6, %s666_s11 }
  0x45   : > { %p675_p0 = por %p674_p10, %p673_p8 }
  0x47   : > { %p676_p2 = pnand %p675_p0, %p669_p13 }
  0xc8   : > { %v199_v24 = vpop.xlane.xlu0 %198 }
  0xc9   : > { %v205_v27 = vpop.xlane.xlu1 %204  ;;  %v210_v29 = vmul.f32 0.00390625, %v199_v24 }
  0xca   : > { %v212_v32 = vmul.f32 0.00390625, %v205_v27 }
  0xcb   : > { %v227_v38 = vrot.slane %v210_v29, %v226_v28 }
  0xcc   : > { %v202_v33 = vpop.xlane.xlu0 %201  ;;  %v239_v40 = vrot.slane %v212_v32, %v238_v31 }
  0xcd   : > { %v211_v35 = vmul.f32 0.00390625, %v202_v33  ;;  %v208_v36 = vpop.xlane.xlu1 %207 }
  0xce   : > { %v213_v37 = vmul.f32 0.00390625, %v208_v36 }
  0xcf   : > { %v232_v39 = vrot.slane %v211_v35, %v231_v30 }
  0xd0   : > { %v246_v41 = vrot.slane %v213_v37, %v245_v34 }
  0xd1   : > { %v234_v42 = vsel %vm233_vm1, %v232_v39, %v227_v38 }
  0xd2   : > { %v241_v43 = vsel %vm240_vm2, %v239_v40, %v234_v42 }
  0xd3   : > { %v248_v44 = vsel %vm247_vm3, %v246_v41, %v241_v43 }
  0xd4   : > { %566 = vmatmul.mubr.msk.f32.vlgmr.msra.gmra.mrb[0].mxu0 %vm249_vm4, %v248_v44 }
 0x1a7   : > { %v318_v46 = vpop.f32.mrb[0].mxu0 }
 0x1a8   : > { %v322_v47 = vmax.f32 %v318_v46, 0.0  ;;  %v567_v48 = vpop.f32.mrb[1].mxu0 }
 0x1aa   : > { %571 = vmatmul.mubr.msk.f32.vlgmr.msra.gmra.mrb[0].mxu1 %vm324_vm6, %v322_v47 }
 0x27d   : > { %v398_v49 = vpop.f32.mrb[0].mxu1 }
 0x27e   : > { %v542_v50 = vmul.f32 -1.442695, %v398_v49  ;;  %v572_v51 = vpop.f32.mrb[1].mxu1 }
 0x280   : > { %632 = vpow2.f32 %v542_v50 }
 0x28a   : > { %v633_v52 = vpop.eup %632 }
 0x28b   : > { %v405_v53 = vadd.f32 1.0, %v633_v52 }
 0x28d   : > { %634 = vrcp.f32 %v405_v53 }
 0x297   : > { %v635_v55 = vpop.eup %634 }
 0x298   : > { %v411_v56 = vrot.slane %v635_v55, %v410_v54 }
 0x29a   : > { %417 = vbcast.lane.b32.xlu1 %v411_v56, 264  ;;  %413 = vbcast.lane.b32.xlu0 %v411_v56, 256 }
 0x29e   : > { %421 = vbcast.lane.b32.xlu1 %v411_v56, 272 }
 0x2a2   : > { %425 = vbcast.lane.b32.xlu1 %v411_v56, 280 }
 0x30c   : > { %v418_v57 = vpop.permute.xlu1 %417  ;;  %v414_v58 = vpop.permute.xlu0 %413 }
 0x30d   : > { %v429_v59 = vmul.f32 %v418_v57, %v887_v5  ;;  %v430_v60 = vmul.f32 %v418_v57, %v889_v6  ;;  %v427_v61 = vmul.f32 %v414_v58, %v877_v0  ;;  %v428_v62 = vmul.f32 %v414_v58, %v879_v1 }
 0x30f   : > { %437 = vst [vmem:[%s188_s27 + $0x10] sm:$0xff] %v429_v59  ;;  %438 = vst [vmem:[%s188_s27 + $0x18] sm:$0xff] %v430_v60 }
 0x310   : > { %435 = vst [vmem:[%s188_s27] sm:$0xff] %v427_v61  ;;  %436 = vst [vmem:[%s188_s27 + $0x8] sm:$0xff] %v428_v62  ;;  %v422_v63 = vpop.permute.xlu1 %421 }
 0x311   : > { %v431_v3 = vmul.f32 %v422_v63, %v881_v2  ;;  %v432_v5 = vmul.f32 %v422_v63, %v885_v4 }
 0x313   : > { %439 = vst [vmem:[%s188_s27 + $0x20] sm:$0xff] %v431_v3  ;;  %440 = vst [vmem:[%s188_s27 + $0x28] sm:$0xff] %v432_v5 }
 0x314   : > { %v426_v0 = vpop.permute.xlu1 %425 }
 0x315   : > { %v433_v1 = vmul.f32 %v426_v0, %v893_v8  ;;  %v434_v2 = vmul.f32 %v426_v0, %v895_v9 }
 0x317   : > { %441 = vst [vmem:[%s188_s27 + $0x30] sm:$0xff] %v433_v1  ;;  %442 = vst [vmem:[%s188_s27 + $0x38] sm:$0xff] %v434_v2 }
 0x318   : > { %679 = shalt.err (!%p676_p2)
}
 0x319   : > { %s680_s7 = scalar_lea.hbm %s930_s10, 1024  ;;  %s684_s19 = scalar_lea.hbm %s979_s3, 2048 }
 0x31a   : > { %p681_p4 = scmp.ne.s32.totalorder %s930_s10, %s680_s7  ;;  %p685_p9 = scmp.lt.u32.totalorder %s930_s10, %s979_s3 }
 0x31b   : > { %p686_p1 = scmp.lt.u32.totalorder %s684_s19, %s680_s7  ;;  %p688_p6 = scmp.lt.u32.totalorder %s680_s7, %s930_s10 }
 0x31c   : > { %p682_p5 = pnand %p681_p4, %p986_p11 }
 0x31d   : > { %p687_p3 = por %p686_p1, %p685_p9 }
 0x31e   : > { %p683_p7 = pneg %p682_p5 }
 0x31f   : > { %p689_p12 = por %p688_p6, %p687_p3 }
 0x321   : > { %p690_p13 = pnand %p689_p12, %p683_p7 }
 0x323   : > { %693 = shalt.err (!%p690_p13)
}
 0x324   : > { %s741_s26 = smov 256   ;;  %s742_s27 = smov 16  }
 0x325   : > { %581 = dma.vmem_to_hbm [thread:$0]  (%p986_p11), %s925_s28, 1024, %s930_s10, %s444_s16, %s741_s26, %s741_s26, %s742_s27  }
 0x326 PF: > { %s472_s29 = sand.u32 1, %s720_s12   ;;  %p987_p8 = scmp.ne.s32.totalorder %s984_s25, 0 }
 0x327   : > { %p988_p10 = scmp.ge.s32.totalorder %s732_s15, 2  ;;  %s473_s30 = scalar_lea.sflag [#allocation4], %s472_s29 }
 0x329   : > { %p588_p0 = pnand %p988_p10, %p987_p8 }
 0x32b   : > { %715 = dma.done.wait (!%p588_p0), %s473_s30, 1024  }
 0x32c   : > { %717 = vsyncadd (!%p588_p0), %s473_s30, 4294966272  ;;  %p16_p2 = scmp.ge.s32.totalorder %s788_s18, 4   ;;  %s989_s12 = smov %s724_s13 }
 0x32d   : > { %s990_s13 = smov %s728_s14  ;;  %s991_s14 = smov %s800_s21 }
 0x32e   : > { %s992_s15 = smov %s788_s18  ;;  %18 = sbr.rel (!%p16_p2) target bundleno = 5 (0x5), region = 77 }
 0x335   :  { %478 = vsyncpa [#allocation3], 1 }
 0x336   :  { %480 = vsyncpa [#allocation3 + $0x1], 1 }
 0x337   :  { %481 = vsyncpa [#allocation4], 1 }
 0x338   :  { %483 = vsyncpa [#allocation4 + $0x1], 1 }

</bundles_post_ra>
